<compile_context>
chip_gen: v7x
topology: tpu7x:2x2x1
jax: 0.10.0
libtpu: 0.0.40
codegen_flags: <defaults>
</compile_context>

<pallas_src>
import jax
import jax.numpy as jnp
from jax.experimental import pallas as pl
from jax.experimental.pallas import tpu as pltpu

_LANES = 128


def _round_up(x, m):
    return ((x + m - 1) // m) * m


def _logreg_kernel(x_ref, p_ref, o_ref):
    # p_ref is a (2,) SMEM array: [weight, bias].
    w = p_ref[0]
    b = p_ref[1]
    z = x_ref[...] * w + b                         # Linear(1, 1): elementwise FMA (VPU)
    o_ref[...] = 0.5 * (jnp.tanh(0.5 * z) + 1.0)   # sigmoid via a single EUP tanh


def logistic_regression_forward(x, w, b, *, tile_rows=1024):
    """x: (N, 1) f32, w: (1, 1) f32, b: (1,) f32  ->  (N, 1) f32"""
    assert tile_rows % 8 == 0
    n = x.shape[0]

    # ---- wrapper-side layout plumbing: make the data lane-dense -------------
    flat = x.reshape(-1).astype(jnp.float32)          # (N,) since feature dim == 1
    total = flat.shape[0]

    rows = pl.cdiv(total, _LANES)                     # rows of 128 lanes each
    rows8 = _round_up(rows, 8)                        # minimum legal row count (sublanes)
    n_tiles = pl.cdiv(rows8, tile_rows)               # grid steps
    tr = _round_up(pl.cdiv(rows8, n_tiles), 8)        # rows per tile (multiple of 8)
    rows_padded = n_tiles * tr
    padded_total = rows_padded * _LANES
    if padded_total != total:
        flat = jnp.pad(flat, (0, padded_total - total))
    x2 = flat.reshape(rows_padded, _LANES)            # lane-dense slab

    params = jnp.concatenate(
        [w.reshape(-1).astype(jnp.float32), b.reshape(-1).astype(jnp.float32)]
    )                                                 # (2,) = [w, b]

    out = pl.pallas_call(
        _logreg_kernel,
        out_shape=jax.ShapeDtypeStruct((rows_padded, _LANES), jnp.float32),
        grid=(n_tiles,),
        in_specs=[
            pl.BlockSpec((tr, _LANES), lambda i: (i, 0)),                # x tile in VMEM
            pl.BlockSpec((2,), lambda i: (0,),
                         memory_space=pltpu.SMEM),                      # [w, b] scalars
        ],
        out_specs=pl.BlockSpec((tr, _LANES), lambda i: (i, 0)),
        compiler_params=pltpu.CompilerParams(
            dimension_semantics=("parallel",),                          # shard rows over TCs (v7x)
        ),
    )(x2, params)

    # slice off the pad and restore the (N, 1) shape
    return out.reshape(-1)[:total].reshape(n, 1)


if __name__ == "__main__":
    key = jax.random.PRNGKey(0)
    kx, kw, kb = jax.random.split(key, 3)

    # Small shape consistent with the module: batch=8, features=1.
    x = jax.random.normal(kx, (8, 1), dtype=jnp.float32)

    # Deterministic parameter init mimicking nn.Linear(1, 1):
    # uniform(-1/sqrt(in_features), 1/sqrt(in_features)) = uniform(-1, 1).
    w = jax.random.uniform(kw, (1, 1), minval=-1.0, maxval=1.0, dtype=jnp.float32)
    b = jax.random.uniform(kb, (1,), minval=-1.0, maxval=1.0, dtype=jnp.float32)

    out = logistic_regression_forward(x, w, b)
    out = jax.block_until_ready(out)

    # Reference check in plain JAX.
    ref = jax.nn.sigmoid(x @ w.T + b)
    assert out.shape == (8, 1)
    assert jnp.allclose(out, ref, atol=2e-6), (out, ref)

    # Larger, non-multiple-of-tile batch exercises padding + multi-step grid.
    kx2 = jax.random.split(key, 4)[3]
    x_big = jax.random.normal(kx2, (300_001, 1), dtype=jnp.float32)
    out_big = jax.block_until_ready(logistic_regression_forward(x_big, w, b))
    ref_big = jax.nn.sigmoid(x_big @ w.T + b)
    assert out_big.shape == (300_001, 1)
    assert jnp.allclose(out_big, ref_big, atol=2e-6)

    print("KERNEL_OK")
</pallas_src>

<mosaic_0001>
module attributes {stable_mosaic.version = 11 : i64} {
  func.func @_logreg_kernel(%arg0: i32, %arg1: memref<8x128xf32, #tpu.memory_space<vmem>>, %arg2: memref<2xf32, #tpu.memory_space<smem>>, %arg3: memref<8x128xf32, #tpu.memory_space<vmem>>) attributes {dimension_semantics = [#tpu.dimension_semantics<parallel>], iteration_bounds = array<i64: 1>, scalar_prefetch = 0 : i64, scratch_operands = 0 : i64, tpu.core_type = #tpu.core_type<tc>, window_params = [{transform_indices = @transform_0, window_bounds = array<i64: 8, 128>}, {transform_indices = @transform_1, window_bounds = array<i64: 2>}, {transform_indices = @transform_2, window_bounds = array<i64: 8, 128>}]} {
    %c0 = arith.constant 0 : index
    %0 = memref.load %arg2[%c0] : memref<2xf32, #tpu.memory_space<smem>>
    %c1 = arith.constant 1 : index
    %1 = memref.load %arg2[%c1] : memref<2xf32, #tpu.memory_space<smem>>
    %c0_0 = arith.constant 0 : index
    %c0_1 = arith.constant 0 : index
    %2 = vector.load %arg1[%c0_0, %c0_1] : memref<8x128xf32, #tpu.memory_space<vmem>>, vector<8x128xf32>
    %3 = vector.broadcast %0 : f32 to vector<8x128xf32>
    %4 = arith.mulf %2, %3 : vector<8x128xf32>
    %5 = vector.broadcast %1 : f32 to vector<8x128xf32>
    %6 = arith.addf %4, %5 : vector<8x128xf32>
    %cst = arith.constant 5.000000e-01 : f32
    %7 = vector.broadcast %cst : f32 to vector<8x128xf32>
    %8 = arith.mulf %7, %6 : vector<8x128xf32>
    %9 = math.tanh %8 : vector<8x128xf32>
    %cst_2 = arith.constant 1.000000e+00 : f32
    %10 = vector.broadcast %cst_2 : f32 to vector<8x128xf32>
    %11 = arith.addf %9, %10 : vector<8x128xf32>
    %cst_3 = arith.constant 5.000000e-01 : f32
    %12 = vector.broadcast %cst_3 : f32 to vector<8x128xf32>
    %13 = arith.mulf %12, %11 : vector<8x128xf32>
    %c0_4 = arith.constant 0 : index
    %c0_5 = arith.constant 0 : index
    %14 = vector.load %arg3[%c0_4, %c0_5] : memref<8x128xf32, #tpu.memory_space<vmem>>, vector<8x128xf32>
    tpu.vector_store %arg3[%c0_4, %c0_5], %13 {strides = array<i32>} : memref<8x128xf32, #tpu.memory_space<vmem>>, vector<8x128xf32>,
    return
  }
  func.func @transform_0(%arg0: i32) -> (i32, i32) {
    %c0_i32 = arith.constant 0 : i32
    %c0_i32_0 = arith.constant 0 : i32
    return %arg0, %c0_i32 : i32, i32
  }
  func.func @transform_1(%arg0: i32) -> i32 {
    %c0_i32 = arith.constant 0 : i32
    %c0_i32_0 = arith.constant 0 : i32
    return %c0_i32 : i32
  }
  func.func @transform_2(%arg0: i32) -> (i32, i32) {
    %c0_i32 = arith.constant 0 : i32
    %c0_i32_0 = arith.constant 0 : i32
    return %arg0, %c0_i32 : i32, i32
  }
}

</mosaic_0001>

<bundles_post_ra>
// kernel: tpu_custom_call.1
= control target key start
LH: loop header
LB: loop body
LE: loop exit
PB: predicated region body
PF: predicated region fallthrough
CT: control target
= control target key end

     0   :  { %7 = vsyncpa [#allocation3], 0  ;;  %s178_s0 = inlined_call_operand.hbm [shape: f32[8,128], index: 0, kind: input, shape index: {}]   ;;  %s179_s1 = inlined_call_operand.vmem [shape: f32[2], index: 1, kind: input, shape index: {}]   ;;  %s180_s2 = inlined_call_operand.hbm [shape: f32[8,128], index: 2, kind: output, shape index: {}]  }
   0x1   :  { %8 = vsyncpa [#allocation5], 0 }
   0x2   :  { %9 = vsyncpa [#allocation4], 0  ;;  %s26_s11 = sshll.u32 %s179_s1, 4  ;;  %s133_s12 = smov [#allocation2]   ;;  %s27_s11 = int_to_ptr.vmem [resolvable:$true] %s26_s11 }
   0x3   :  { %s16_s13 = sshll.u32 %s133_s12, 4  ;;  %s71_s16 = scalar_lea.hbm %s178_s0, 128  ;;  %s17_s13 = int_to_ptr.vmem [resolvable:$true] %s16_s13 }
   0x4   :  { %p72_p0 = scmp.ne.s32.totalorder %s178_s0, %s71_s16  ;;  %p75_p1 = scmp.lt.u32.totalorder %s71_s16, %s178_s0 }
   0x6   :  { %p77_p2 = pnand %p75_p1, %p72_p0 }
   0x8   :  { %80 = shalt.err (!%p77_p2)
}
   0x9   :  { %s81_s21 = scalar_lea.vmem %s17_s13, 128  ;;  %p86_p4 = scmp.lt.s32.totalorder %s17_s13, %s17_s13 }
   0xa   :  { %p82_p3 = scmp.ne.s32.totalorder %s17_s13, %s81_s21  ;;  %p87_p5 = scmp.lt.s32.totalorder %s81_s21, %s81_s21 }
   0xc   :  { %p88_p6 = por %p87_p5, %p86_p4 }
   0xe   :  { %p89_p7 = pnand %p88_p6, %p82_p3 }
  0x10   :  { %92 = shalt.err (!%p89_p7)
}
  0x11   :  { %19 = dma.hbm_to_vmem [thread:$0]  %s178_s0, 128, %s17_s13, [#allocation3]  }
  0x12   :  { %s93_s23 = scalar_lea.vmem %s27_s11, 16  ;;  %p98_p9 = scmp.lt.s32.totalorder %s27_s11, %s27_s11 }
  0x13   :  { %p94_p8 = scmp.ne.s32.totalorder %s27_s11, %s93_s23  ;;  %p99_p10 = scmp.lt.s32.totalorder %s93_s23, %s93_s23 }
  0x15   :  { %p100_p11 = por %p99_p10, %p98_p9 }
  0x17   :  { %p101_p12 = pnand %p100_p11, %p94_p8 }
  0x19   :  { %104 = shalt.err (!%p101_p12)
}
  0x1a   :  { %s134_s24 = smov [#allocation6]  }
  0x1b   :  { %29 = dma.vmem_to_smem %s27_s11, 16, %s134_s24, [#allocation5]  }
  0x1c   :  { %127 = dma.done.wait [#allocation3], 128  }
  0x1d   :  { %128 = vsyncadd [#allocation3], 4294967168 }
  0x1e   :  { %129 = dma.done.wait [#allocation5], 16  }
  0x1f   :  { %130 = vsyncadd [#allocation5], 4294967280 }
  0x20   :  { %36 = sfence }
  0x21   :  { %s37_s25 = sld [smem:[#allocation6]]  ;;  %s65_s26 = sld [smem:[#allocation6 + $0x1]]  ;;  %v39_v0 = vld [vmem:[#allocation2] sm:$0xff] }
  0x22   :  { %s135_s0 = smov [#allocation7]  }
  0x23   :  { %s55_s27 = sshll.u32 %s135_s0, 4  ;;  %s56_s27 = int_to_ptr.vmem [resolvable:$true] %s55_s27 }
  0x24   :  { %s105_s28 = scalar_lea.vmem %s56_s27, 128  ;;  %p110_p0 = scmp.lt.s32.totalorder %s56_s27, %s56_s27 }
  0x25   :  { %p106_p13 = scmp.ne.s32.totalorder %s56_s27, %s105_s28  ;;  %p111_p1 = scmp.lt.s32.totalorder %s105_s28, %s105_s28 }
  0x27   :  { %v40_v1 = vstv %s37_s25  ;;  %v42_v2 = vstv %s65_s26  ;;  %p112_p2 = por %p111_p1, %p110_p0 }
  0x28   :  { %v41_v3 = vmul.f32 %v40_v1, %v39_v0 }
  0x29   :  { %p113_p3 = pnand %p112_p2, %p106_p13 }
  0x2a   :  { %v43_v4 = vadd.f32 %v42_v2, %v41_v3 }
  0x2c   :  { %v44_v5 = vmul.f32 0.5, %v43_v4 }
  0x2e   :  { %69 = vtanh.f32 %v44_v5 }
  0x38   :  { %v70_v6 = vpop.eup %69 }
  0x39   :  { %v46_v7 = vadd.f32 1.0, %v70_v6 }
  0x3b   :  { %v47_v8 = vmul.f32 0.5, %v46_v7 }
  0x3d   :  { %48 = vst [vmem:[#allocation7] sm:$0xff] %v47_v8 }
  0x3e   :  { %116 = shalt.err (!%p113_p3)
}
  0x3f   :  { %s117_s3 = scalar_lea.hbm %s180_s2, 128 }
  0x40   :  { %p118_p4 = scmp.ne.s32.totalorder %s180_s2, %s117_s3  ;;  %p121_p5 = scmp.lt.u32.totalorder %s117_s3, %s180_s2 }
  0x42   :  { %p123_p6 = pnand %p121_p5, %p118_p4 }
  0x44   :  { %126 = shalt.err (!%p123_p6)
}
  0x45   :  { %58 = dma.vmem_to_hbm [thread:$0]  %s56_s27, 128, %s180_s2, [#allocation4]  }
  0x46   :  { %131 = dma.done.wait [#allocation4], 128  }
  0x47   :  { %132 = vsyncadd [#allocation4], 4294967168 }
  0x48   :  { %62 = vsyncpa [#allocation3], 1 }
  0x49   :  { %63 = vsyncpa [#allocation4], 1 }
  0x4a   :  { %64 = vsyncpa [#allocation5], 1 }

</bundles_post_ra>
